<compile_context>
chip_gen: v5e
topology: v5e:2x2
jax: 0.10.0
libtpu: 0.0.40
codegen_flags: <defaults>
</compile_context>

<pallas_src>
import functools

import jax
import jax.numpy as jnp
from jax.experimental import pallas as pl
from jax.experimental.pallas import tpu as pltpu


LN_EPS = 1e-5
NEG_BIG = -1e30        # finite "minus infinity" for padded logit lanes


def _round_up(x, m):
    return ((x + m - 1) // m) * m


def _ln_relu(y, gamma, beta, ew_dtype):
    """LayerNorm (stats in f32, single-pass variance) -> affine -> ReLU -> bf16."""
    mu = jnp.mean(y, axis=-1, keepdims=True)
    var = jnp.maximum(jnp.mean(y * y, axis=-1, keepdims=True) - mu * mu, 0.0)
    norm = ((y - mu) * jax.lax.rsqrt(var + LN_EPS)).astype(ew_dtype)
    h = jnp.maximum(norm * gamma.astype(ew_dtype) + beta.astype(ew_dtype), 0.0)
    return h.astype(jnp.bfloat16)


def ppo_forward_kernel(state_ref, w1_ref, p1_ref, w2_ref, p2_ref, wh_ref, bh_ref,
                       probs_ref, value_ref, *, ew_dtype):
    # matmul operands in bf16 (MXU), accumulation + LN/softmax statistics in f32
    x = state_ref[...].astype(jnp.bfloat16)                              # (TB, D)

    # shared layer 1: Linear -> LayerNorm -> ReLU
    p1 = p1_ref[...]                                                     # (3, H0): bias / gamma / beta
    y1 = jnp.dot(x, w1_ref[...], preferred_element_type=jnp.float32) + p1[0:1, :]
    h1 = _ln_relu(y1, p1[1:2, :], p1[2:3, :], ew_dtype)                  # (TB, H0) bf16

    # shared layer 2: Linear -> LayerNorm -> ReLU
    p2 = p2_ref[...]                                                     # (3, H1)
    y2 = jnp.dot(h1, w2_ref[...], preferred_element_type=jnp.float32) + p2[0:1, :]
    h2 = _ln_relu(y2, p2[1:2, :], p2[2:3, :], ew_dtype)                  # (TB, H1) bf16

    # fused heads: lanes [0, A) = actor logits, [A, NH-1) = pad (bias -1e30),
    # lane NH-1 = critic value.  One (H1, 128) MXU pass.
    fused = jnp.dot(h2, wh_ref[...], preferred_element_type=jnp.float32) + bh_ref[...]

    nh = fused.shape[-1]
    lane = jax.lax.broadcasted_iota(jnp.int32, fused.shape, dimension=1)
    is_value = lane == (nh - 1)

    # softmax over the full 128-lane vreg; pad + critic lanes contribute exp(.)=0,
    # so the stored pad lanes are exact zeros (no final select needed).
    logits = jnp.where(is_value, NEG_BIG, fused)
    m = jnp.max(logits, axis=-1, keepdims=True)
    e = jnp.exp(logits - m)
    inv = pl.reciprocal(jnp.sum(e, axis=-1, keepdims=True))   # exact: probs sum to 1
    probs_ref[...] = (e * inv).astype(probs_ref.dtype)        # lane-dense bf16 store

    # critic value: pick out lane NH-1 via a masked cross-lane sum (exact — all
    # other lanes contribute 0.0) and store as a narrow (TB, 1) f32 column.
    # TODO(synk): if the value feeds f32 GAE in training, consider an f32 critic matmul.
    value_ref[...] = jnp.sum(jnp.where(is_value, fused, 0.0), axis=-1, keepdims=True)


def pack_params(params):
    """One-time packing: fuse actor+critic heads, pack LN params, cast weights to bf16.

    Hoisted out of the per-call path so every forward pays zero XLA pad/concat/cast
    passes over the weights.
    """
    A = params["wa"].shape[1]
    H1 = params["w2"].shape[1]
    NH = max(128, _round_up(A + 1, 128))          # padded, lane-dense head width

    wh = jnp.zeros((H1, NH), jnp.float32)
    wh = wh.at[:, :A].set(params["wa"]).at[:, NH - 1:NH].set(params["wc"])
    bh = jnp.full((1, NH), NEG_BIG, jnp.float32)
    bh = bh.at[:, :A].set(params["ba"]).at[:, NH - 1:NH].set(params["bc"])

    p1 = jnp.concatenate([params["b1"], params["g1"], params["be1"]], axis=0)   # (3, H0)
    p2 = jnp.concatenate([params["b2"], params["g2"], params["be2"]], axis=0)   # (3, H1)

    return dict(
        w1=params["w1"].astype(jnp.bfloat16),
        p1=p1,
        w2=params["w2"].astype(jnp.bfloat16),
        p2=p2,
        wh=wh.astype(jnp.bfloat16),
        bh=bh,
        action_dim=A,
        nh=NH,
    )


def ppo_forward(state, packed, *, block_b=2048, elementwise_dtype=None):
    """Fused PPO forward. state: (B, input_dim) f32; packed: from pack_params().

    Returns (action_probs (B, A) f32, value (B, 1) f32).
    """
    B, D = state.shape
    A, NH = packed["action_dim"], packed["nh"]
    H0 = packed["w1"].shape[1]
    H1 = packed["w2"].shape[1]

    if elementwise_dtype is None:
        # bf16 VPU exists on v6e/v7x; v5e (and older) keep elementwise math in f32.
        kind = jax.devices()[0].device_kind.lower()
        elementwise_dtype = jnp.bfloat16 if ("v6" in kind or "v7" in kind) else jnp.float32

    # ---- batch tiling: large tiles (per-step overhead ~0.35us), >=2 grid steps
    # when the batch allows it so v7x's two TensorCores both get a share. ----
    B8 = _round_up(B, 8)
    tb = min(block_b, B8)
    if B8 >= 16 and B8 <= tb:                       # would be a single grid step
        tb = _round_up(pl.cdiv(B8, 2), 8)           # ~half, 8-aligned -> 2 steps
    Bp = _round_up(B8, tb)
    if Bp != B:
        state = jnp.pad(state, ((0, Bp - B), (0, 0)))

    kernel = functools.partial(ppo_forward_kernel, ew_dtype=elementwise_dtype)

    probs_p, value_p = pl.pallas_call(
        kernel,
        out_shape=(
            jax.ShapeDtypeStruct((Bp, NH), jnp.bfloat16),   # lane-dense bf16 probs tile
            jax.ShapeDtypeStruct((Bp, 1), jnp.float32),     # narrow f32 value column
        ),
        grid=(Bp // tb,),
        in_specs=[
            pl.BlockSpec((tb, D), lambda i: (i, 0)),     # state: tiled over batch
            pl.BlockSpec((D, H0), lambda i: (0, 0)),     # weights / params: VMEM-resident
            pl.BlockSpec((3, H0), lambda i: (0, 0)),
            pl.BlockSpec((H0, H1), lambda i: (0, 0)),
            pl.BlockSpec((3, H1), lambda i: (0, 0)),
            pl.BlockSpec((H1, NH), lambda i: (0, 0)),
            pl.BlockSpec((1, NH), lambda i: (0, 0)),
        ],
        out_specs=(
            pl.BlockSpec((tb, NH), lambda i: (i, 0)),
            pl.BlockSpec((tb, 1), lambda i: (i, 0)),
        ),
        compiler_params=pltpu.CompilerParams(
            dimension_semantics=("parallel",),
            vmem_limit_bytes=48 * 1024 * 1024,   # above v5e's 16 MiB default, < v7x 64 MiB physical
        ),
    )(state, packed["w1"], packed["p1"], packed["w2"], packed["p2"],
      packed["wh"], packed["bh"])

    # Only trims padding lanes/rows (tiny); the heavy (Bp,128) writeback already
    # happened in bf16 and is not re-read at full width.
    probs = probs_p[:B, :A].astype(jnp.float32)
    value = value_p[:B]
    return probs, value


def init_params(key, input_dim, action_dim, hidden_dims=(256, 128)):
    """Deterministic synthetic parameters (PyTorch-Linear-like uniform init), f32."""
    h0, h1 = hidden_dims
    ks = jax.random.split(key, 8)

    def lin(kw, kb, fan_in, fan_out):
        bound = 1.0 / jnp.sqrt(fan_in)
        w = jax.random.uniform(kw, (fan_in, fan_out), jnp.float32, -bound, bound)
        b = jax.random.uniform(kb, (1, fan_out), jnp.float32, -bound, bound)
        return w, b

    w1, b1 = lin(ks[0], ks[1], input_dim, h0)
    w2, b2 = lin(ks[2], ks[3], h0, h1)
    wa, ba = lin(ks[4], ks[5], h1, action_dim)
    wc, bc = lin(ks[6], ks[7], h1, 1)

    return dict(
        w1=w1, b1=b1, g1=jnp.ones((1, h0), jnp.float32), be1=jnp.zeros((1, h0), jnp.float32),
        w2=w2, b2=b2, g2=jnp.ones((1, h1), jnp.float32), be2=jnp.zeros((1, h1), jnp.float32),
        wa=wa, ba=ba, wc=wc, bc=bc,
    )


def ppo_forward_ref(state, p):
    """Pure-JAX f32 reference for validation."""
    def ln(x):
        mu = jnp.mean(x, axis=-1, keepdims=True)
        var = jnp.mean((x - mu) ** 2, axis=-1, keepdims=True)
        return (x - mu) * jax.lax.rsqrt(var + LN_EPS)

    h1 = jnp.maximum(ln(state @ p["w1"] + p["b1"]) * p["g1"] + p["be1"], 0.0)
    h2 = jnp.maximum(ln(h1 @ p["w2"] + p["b2"]) * p["g2"] + p["be2"], 0.0)
    logits = h2 @ p["wa"] + p["ba"]
    probs = jax.nn.softmax(logits, axis=-1)
    value = h2 @ p["wc"] + p["bc"]
    return probs, value


if __name__ == "__main__":
    INPUT_DIM = 32
    ACTION_DIM = 8
    BATCH = 8

    key = jax.random.PRNGKey(0)
    k_state, k_params = jax.random.split(key)

    state = jax.random.normal(k_state, (BATCH, INPUT_DIM), jnp.float32)
    params = init_params(k_params, INPUT_DIM, ACTION_DIM)
    packed = pack_params(params)            # one-time: head fusion + bf16 casts

    probs, value = jax.block_until_ready(ppo_forward(state, packed))
    probs_ref, value_ref = ppo_forward_ref(state, params)

    assert probs.shape == (BATCH, ACTION_DIM) and value.shape == (BATCH, 1)
    # Kernel uses bf16 MXU operands + bf16 probs storage; compare against the f32
    # reference with a correspondingly looser tolerance.
    assert jnp.allclose(probs, probs_ref, atol=5e-2, rtol=5e-2)
    assert jnp.allclose(value, value_ref, atol=5e-2, rtol=5e-2)
    assert jnp.allclose(jnp.sum(probs, axis=-1), 1.0, atol=1e-2)

    print("KERNEL_OK")
</pallas_src>

<mosaic_0001>
module attributes {stable_mosaic.version = 11 : i64} {
  func.func @ppo_forward_kernel(%arg0: i32, %arg1: memref<8x32xf32, #tpu.memory_space<vmem>>, %arg2: memref<32x256xbf16, #tpu.memory_space<vmem>>, %arg3: memref<3x256xf32, #tpu.memory_space<vmem>>, %arg4: memref<256x128xbf16, #tpu.memory_space<vmem>>, %arg5: memref<3x128xf32, #tpu.memory_space<vmem>>, %arg6: memref<128x128xbf16, #tpu.memory_space<vmem>>, %arg7: memref<1x128xf32, #tpu.memory_space<vmem>>, %arg8: memref<8x128xbf16, #tpu.memory_space<vmem>>, %arg9: memref<8x1xf32, #tpu.memory_space<vmem>>) attributes {dimension_semantics = [#tpu.dimension_semantics<parallel>], iteration_bounds = array<i64: 1>, scalar_prefetch = 0 : i64, scratch_operands = 0 : i64, tpu.core_type = #tpu.core_type<tc>, window_params = [{transform_indices = @transform_0, window_bounds = array<i64: 8, 32>}, {pipeline_mode = #tpu.pipeline_mode<synchronous>, transform_indices = @transform_1, window_bounds = array<i64: 32, 256>}, {pipeline_mode = #tpu.pipeline_mode<synchronous>, transform_indices = @transform_2, window_bounds = array<i64: 3, 256>}, {pipeline_mode = #tpu.pipeline_mode<synchronous>, transform_indices = @transform_3, window_bounds = array<i64: 256, 128>}, {pipeline_mode = #tpu.pipeline_mode<synchronous>, transform_indices = @transform_4, window_bounds = array<i64: 3, 128>}, {pipeline_mode = #tpu.pipeline_mode<synchronous>, transform_indices = @transform_5, window_bounds = array<i64: 128, 128>}, {pipeline_mode = #tpu.pipeline_mode<synchronous>, transform_indices = @transform_6, window_bounds = array<i64: 1, 128>}, {transform_indices = @transform_7, window_bounds = array<i64: 8, 128>}, {transform_indices = @transform_8, window_bounds = array<i64: 8, 1>}]} {
    %c0 = arith.constant 0 : index
    %c0_0 = arith.constant 0 : index
    %0 = vector.load %arg1[%c0, %c0_0] : memref<8x32xf32, #tpu.memory_space<vmem>>, vector<8x32xf32>
    %1 = arith.truncf %0 : vector<8x32xf32> to vector<8x32xbf16>
    %c0_1 = arith.constant 0 : index
    %c0_2 = arith.constant 0 : index
    %2 = vector.load %arg3[%c0_1, %c0_2] : memref<3x256xf32, #tpu.memory_space<vmem>>, vector<3x256xf32>
    %c0_3 = arith.constant 0 : index
    %c0_4 = arith.constant 0 : index
    %3 = vector.load %arg2[%c0_3, %c0_4] : memref<32x256xbf16, #tpu.memory_space<vmem>>, vector<32x256xbf16>
    %cst = arith.constant dense<0.000000e+00> : vector<8x256xf32>
    %4 = tpu.matmul %1, %3, %cst {dimension_numbers = #tpu.dot_dimension_numbers<[1], [0], [0], [1], [0, 0, 1, 1], [], []>} : vector<8x32xbf16>, vector<32x256xbf16>, vector<8x256xf32> -> vector<8x256xf32>
    %5 = vector.extract_strided_slice %2 {offsets = [0, 0], sizes = [1, 256], strides = [1, 1]} : vector<3x256xf32> to vector<1x256xf32>
    %6 = vector.broadcast %5 : vector<1x256xf32> to vector<8x256xf32>
    %7 = arith.addf %4, %6 : vector<8x256xf32>
    %8 = vector.extract_strided_slice %2 {offsets = [1, 0], sizes = [1, 256], strides = [1, 1]} : vector<3x256xf32> to vector<1x256xf32>
    %9 = vector.extract_strided_slice %2 {offsets = [2, 0], sizes = [1, 256], strides = [1, 1]} : vector<3x256xf32> to vector<1x256xf32>
    %cst_5 = arith.constant dense<0.000000e+00> : vector<8xf32>
    %10 = vector.multi_reduction <add>, %7, %cst_5 [1] : vector<8x256xf32> to vector<8xf32>
    %11 = vector.shape_cast %10 : vector<8xf32> to vector<8x1xf32>
    %cst_6 = arith.constant 2.560000e+02 : f32
    %12 = vector.broadcast %cst_6 : f32 to vector<8x1xf32>
    %13 = arith.divf %11, %12 : vector<8x1xf32>
    %14 = arith.mulf %7, %7 : vector<8x256xf32>
    %cst_7 = arith.constant dense<0.000000e+00> : vector<8xf32>
    %15 = vector.multi_reduction <add>, %14, %cst_7 [1] : vector<8x256xf32> to vector<8xf32>
    %16 = vector.shape_cast %15 : vector<8xf32> to vector<8x1xf32>
    %cst_8 = arith.constant 2.560000e+02 : f32
    %17 = vector.broadcast %cst_8 : f32 to vector<8x1xf32>
    %18 = arith.divf %16, %17 : vector<8x1xf32>
    %19 = arith.mulf %13, %13 : vector<8x1xf32>
    %20 = arith.subf %18, %19 : vector<8x1xf32>
    %cst_9 = arith.constant 0.000000e+00 : f32
    %21 = vector.broadcast %cst_9 : f32 to vector<8x1xf32>
    %22 = arith.maximumf %20, %21 : vector<8x1xf32>
    %23 = vector.broadcast %13 : vector<8x1xf32> to vector<8x256xf32>
    %24 = arith.subf %7, %23 : vector<8x256xf32>
    %cst_10 = arith.constant 9.99999974E-6 : f32
    %25 = vector.broadcast %cst_10 : f32 to vector<8x1xf32>
    %26 = arith.addf %22, %25 : vector<8x1xf32>
    %27 = math.rsqrt %26 : vector<8x1xf32>
    %28 = vector.broadcast %27 : vector<8x1xf32> to vector<8x256xf32>
    %29 = arith.mulf %24, %28 : vector<8x256xf32>
    %30 = vector.broadcast %8 : vector<1x256xf32> to vector<8x256xf32>
    %31 = arith.mulf %29, %30 : vector<8x256xf32>
    %32 = vector.broadcast %9 : vector<1x256xf32> to vector<8x256xf32>
    %33 = arith.addf %31, %32 : vector<8x256xf32>
    %cst_11 = arith.constant 0.000000e+00 : f32
    %34 = vector.broadcast %cst_11 : f32 to vector<8x256xf32>
    %35 = arith.maximumf %33, %34 : vector<8x256xf32>
    %36 = arith.truncf %35 : vector<8x256xf32> to vector<8x256xbf16>
    %c0_12 = arith.constant 0 : index
    %c0_13 = arith.constant 0 : index
    %37 = vector.load %arg5[%c0_12, %c0_13] : memref<3x128xf32, #tpu.memory_space<vmem>>, vector<3x128xf32>
    %c0_14 = arith.constant 0 : index
    %c0_15 = arith.constant 0 : index
    %38 = vector.load %arg4[%c0_14, %c0_15] : memref<256x128xbf16, #tpu.memory_space<vmem>>, vector<256x128xbf16>
    %cst_16 = arith.constant dense<0.000000e+00> : vector<8x128xf32>
    %39 = tpu.matmul %36, %38, %cst_16 {dimension_numbers = #tpu.dot_dimension_numbers<[1], [0], [0], [1], [0, 0, 1, 1], [], []>} : vector<8x256xbf16>, vector<256x128xbf16>, vector<8x128xf32> -> vector<8x128xf32>
    %40 = vector.extract_strided_slice %37 {offsets = [0, 0], sizes = [1, 128], strides = [1, 1]} : vector<3x128xf32> to vector<1x128xf32>
    %41 = vector.broadcast %40 : vector<1x128xf32> to vector<8x128xf32>
    %42 = arith.addf %39, %41 : vector<8x128xf32>
    %43 = vector.extract_strided_slice %37 {offsets = [1, 0], sizes = [1, 128], strides = [1, 1]} : vector<3x128xf32> to vector<1x128xf32>
    %44 = vector.extract_strided_slice %37 {offsets = [2, 0], sizes = [1, 128], strides = [1, 1]} : vector<3x128xf32> to vector<1x128xf32>
    %cst_17 = arith.constant dense<0.000000e+00> : vector<8xf32>
    %45 = vector.multi_reduction <add>, %42, %cst_17 [1] : vector<8x128xf32> to vector<8xf32>
    %46 = vector.shape_cast %45 : vector<8xf32> to vector<8x1xf32>
    %cst_18 = arith.constant 1.280000e+02 : f32
    %47 = vector.broadcast %cst_18 : f32 to vector<8x1xf32>
    %48 = arith.divf %46, %47 : vector<8x1xf32>
    %49 = arith.mulf %42, %42 : vector<8x128xf32>
    %cst_19 = arith.constant dense<0.000000e+00> : vector<8xf32>
    %50 = vector.multi_reduction <add>, %49, %cst_19 [1] : vector<8x128xf32> to vector<8xf32>
    %51 = vector.shape_cast %50 : vector<8xf32> to vector<8x1xf32>
    %cst_20 = arith.constant 1.280000e+02 : f32
    %52 = vector.broadcast %cst_20 : f32 to vector<8x1xf32>
    %53 = arith.divf %51, %52 : vector<8x1xf32>
    %54 = arith.mulf %48, %48 : vector<8x1xf32>
    %55 = arith.subf %53, %54 : vector<8x1xf32>
    %cst_21 = arith.constant 0.000000e+00 : f32
    %56 = vector.broadcast %cst_21 : f32 to vector<8x1xf32>
    %57 = arith.maximumf %55, %56 : vector<8x1xf32>
    %58 = vector.broadcast %48 : vector<8x1xf32> to vector<8x128xf32>
    %59 = arith.subf %42, %58 : vector<8x128xf32>
    %cst_22 = arith.constant 9.99999974E-6 : f32
    %60 = vector.broadcast %cst_22 : f32 to vector<8x1xf32>
    %61 = arith.addf %57, %60 : vector<8x1xf32>
    %62 = math.rsqrt %61 : vector<8x1xf32>
    %63 = vector.broadcast %62 : vector<8x1xf32> to vector<8x128xf32>
    %64 = arith.mulf %59, %63 : vector<8x128xf32>
    %65 = vector.broadcast %43 : vector<1x128xf32> to vector<8x128xf32>
    %66 = arith.mulf %64, %65 : vector<8x128xf32>
    %67 = vector.broadcast %44 : vector<1x128xf32> to vector<8x128xf32>
    %68 = arith.addf %66, %67 : vector<8x128xf32>
    %cst_23 = arith.constant 0.000000e+00 : f32
    %69 = vector.broadcast %cst_23 : f32 to vector<8x128xf32>
    %70 = arith.maximumf %68, %69 : vector<8x128xf32>
    %71 = arith.truncf %70 : vector<8x128xf32> to vector<8x128xbf16>
    %c0_24 = arith.constant 0 : index
    %c0_25 = arith.constant 0 : index
    %72 = vector.load %arg6[%c0_24, %c0_25] : memref<128x128xbf16, #tpu.memory_space<vmem>>, vector<128x128xbf16>
    %cst_26 = arith.constant dense<0.000000e+00> : vector<8x128xf32>
    %73 = tpu.matmul %71, %72, %cst_26 {dimension_numbers = #tpu.dot_dimension_numbers<[1], [0], [0], [1], [0, 0, 1, 1], [], []>} : vector<8x128xbf16>, vector<128x128xbf16>, vector<8x128xf32> -> vector<8x128xf32>
    %c0_27 = arith.constant 0 : index
    %c0_28 = arith.constant 0 : index
    %74 = vector.load %arg7[%c0_27, %c0_28] : memref<1x128xf32, #tpu.memory_space<vmem>>, vector<1x128xf32>
    %75 = vector.broadcast %74 : vector<1x128xf32> to vector<8x128xf32>
    %76 = arith.addf %73, %75 : vector<8x128xf32>
    %77 = tpu.iota {dimensions = array<i32: 1>} : vector<8x128xi32>
    %c127_i32 = arith.constant 127 : i32
    %78 = vector.broadcast %c127_i32 : i32 to vector<8x128xi32>
    %79 = arith.cmpi eq, %77, %78 : vector<8x128xi32>
    %cst_29 = arith.constant -1.000000e+30 : f32
    %80 = vector.broadcast %cst_29 : f32 to vector<8x128xf32>
    %81 = arith.select %79, %80, %76 : vector<8x128xi1>, vector<8x128xf32>
    %cst_30 = arith.constant dense<0xFF800000> : vector<8xf32>
    %82 = vector.multi_reduction <maximumf>, %81, %cst_30 [1] : vector<8x128xf32> to vector<8xf32>
    %83 = vector.shape_cast %82 : vector<8xf32> to vector<8x1xf32>
    %84 = vector.broadcast %83 : vector<8x1xf32> to vector<8x128xf32>
    %85 = arith.subf %81, %84 : vector<8x128xf32>
    %86 = math.exp %85 : vector<8x128xf32>
    %cst_31 = arith.constant dense<0.000000e+00> : vector<8xf32>
    %87 = vector.multi_reduction <add>, %86, %cst_31 [1] : vector<8x128xf32> to vector<8xf32>
    %88 = vector.shape_cast %87 : vector<8xf32> to vector<8x1xf32>
    %89 = tpu.reciprocal %88 : vector<8x1xf32> -> vector<8x1xf32>
    %90 = vector.broadcast %89 : vector<8x1xf32> to vector<8x128xf32>
    %91 = arith.mulf %86, %90 : vector<8x128xf32>
    %92 = arith.truncf %91 : vector<8x128xf32> to vector<8x128xbf16>
    %c0_32 = arith.constant 0 : index
    %c0_33 = arith.constant 0 : index
    %93 = vector.load %arg8[%c0_32, %c0_33] : memref<8x128xbf16, #tpu.memory_space<vmem>>, vector<8x128xbf16>
    tpu.vector_store %arg8[%c0_32, %c0_33], %92 {strides = array<i32>} : memref<8x128xbf16, #tpu.memory_space<vmem>>, vector<8x128xbf16>,
    %cst_34 = arith.constant 0.000000e+00 : f32
    %94 = vector.broadcast %cst_34 : f32 to vector<8x128xf32>
    %95 = arith.select %79, %76, %94 : vector<8x128xi1>, vector<8x128xf32>
    %cst_35 = arith.constant dense<0.000000e+00> : vector<8xf32>
    %96 = vector.multi_reduction <add>, %95, %cst_35 [1] : vector<8x128xf32> to vector<8xf32>
    %97 = vector.shape_cast %96 : vector<8xf32> to vector<8x1xf32>
    %c0_36 = arith.constant 0 : index
    %c0_37 = arith.constant 0 : index
    %98 = vector.load %arg9[%c0_36, %c0_37] : memref<8x1xf32, #tpu.memory_space<vmem>>, vector<8x1xf32>
    tpu.vector_store %arg9[%c0_36, %c0_37], %97 {strides = array<i32>} : memref<8x1xf32, #tpu.memory_space<vmem>>, vector<8x1xf32>,
    return
  }
  func.func @transform_0(%arg0: i32) -> (i32, i32) {
    %c0_i32 = arith.constant 0 : i32
    %c0_i32_0 = arith.constant 0 : i32
    return %arg0, %c0_i32 : i32, i32
  }
  func.func @transform_1(%arg0: i32) -> (i32, i32) {
    %c0_i32 = arith.constant 0 : i32
    %c0_i32_0 = arith.constant 0 : i32
    %c0_i32_1 = arith.constant 0 : i32
    return %c0_i32, %c0_i32_0 : i32, i32
  }
  func.func @transform_2(%arg0: i32) -> (i32, i32) {
    %c0_i32 = arith.constant 0 : i32
    %c0_i32_0 = arith.constant 0 : i32
    %c0_i32_1 = arith.constant 0 : i32
    return %c0_i32, %c0_i32_0 : i32, i32
  }
  func.func @transform_3(%arg0: i32) -> (i32, i32) {
    %c0_i32 = arith.constant 0 : i32
    %c0_i32_0 = arith.constant 0 : i32
    %c0_i32_1 = arith.constant 0 : i32
    return %c0_i32, %c0_i32_0 : i32, i32
  }
  func.func @transform_4(%arg0: i32) -> (i32, i32) {
    %c0_i32 = arith.constant 0 : i32
    %c0_i32_0 = arith.constant 0 : i32
    %c0_i32_1 = arith.constant 0 : i32
    return %c0_i32, %c0_i32_0 : i32, i32
  }
  func.func @transform_5(%arg0: i32) -> (i32, i32) {
    %c0_i32 = arith.constant 0 : i32
    %c0_i32_0 = arith.constant 0 : i32
    %c0_i32_1 = arith.constant 0 : i32
    return %c0_i32, %c0_i32_0 : i32, i32
  }
  func.func @transform_6(%arg0: i32) -> (i32, i32) {
    %c0_i32 = arith.constant 0 : i32
    %c0_i32_0 = arith.constant 0 : i32
    %c0_i32_1 = arith.constant 0 : i32
    return %c0_i32, %c0_i32_0 : i32, i32
  }
  func.func @transform_7(%arg0: i32) -> (i32, i32) {
    %c0_i32 = arith.constant 0 : i32
    %c0_i32_0 = arith.constant 0 : i32
    return %arg0, %c0_i32 : i32, i32
  }
  func.func @transform_8(%arg0: i32) -> (i32, i32) {
    %c0_i32 = arith.constant 0 : i32
    %c0_i32_0 = arith.constant 0 : i32
    return %arg0, %c0_i32 : i32, i32
  }
}

</mosaic_0001>

<bundles_post_ra>
// kernel: tpu_custom_call.1
= control target key start
LH: loop header
LB: loop body
LE: loop exit
PB: predicated region body
PF: predicated region fallthrough
CT: control target
= control target key end

     0   :  { %14 = vsyncpa [#allocation3], 0  ;;  %s1018_s0 = inlined_call_operand.hbm [shape: f32[8,32], index: 0, kind: input, shape index: {}]   ;;  %s1019_s1 = inlined_call_operand.hbm [shape: bf16[32,256], index: 1, kind: input, shape index: {}]   ;;  %s1020_s2 = inlined_call_operand.hbm [shape: f32[3,256], index: 2, kind: input, shape index: {}]   ;;  %s1021_s3 = inlined_call_operand.hbm [shape: bf16[256,128], index: 3, kind: input, shape index: {}]   ;;  %s1022_s4 = inlined_call_operand.hbm [shape: f32[3,128], index: 4, kind: input, shape index: {}]   ;;  %s1023_s5 = inlined_call_operand.hbm [shape: bf16[128,128], index: 5, kind: input, shape index: {}]   ;;  %s1024_s6 = inlined_call_operand.vmem [shape: f32[1,128], index: 6, kind: input, shape index: {}]   ;;  %s1025_s7 = inlined_call_operand.hbm [shape: bf16[8,128], index: 7, kind: output, shape index: {0}]   ;;  %s1026_s8 = inlined_call_operand.vmem [shape: f32[8,1], index: 8, kind: output, shape index: {1}]  }
   0x1   :  { %15 = vsyncpa [#allocation6], 0 }
   0x2   :  { %16 = vsyncpa [#allocation9], 0 }
   0x3   :  { %17 = vsyncpa [#allocation12], 0  ;;  %s34_s29 = sshll.u32 %s1019_s1, 4  ;;  %s35_s29 = int_to_ptr.hbm [resolvable:$true] %s34_s29 }
   0x4   :  { %18 = vsyncpa [#allocation4], 0  ;;  %s913_s30 = smov [#allocation5]   ;;  %s58_s12 = sshll.u32 %s1021_s3, 4  ;;  %s59_s12 = int_to_ptr.hbm [resolvable:$true] %s58_s12 }
   0x5   :  { %s36_s9 = sshll.u32 %s913_s30, 4  ;;  %s914_s13 = smov 128   ;;  %s37_s9 = int_to_ptr.vmem [resolvable:$true] %s36_s9 }
   0x6   :  { %s915_s14 = smov 8   ;;  %s916_s15 = smov [#allocation8]  }
   0x7   :  { %42 = dma.hbm_to_vmem [thread:$0]  %s35_s29, 512, %s37_s9, [#allocation6], %s914_s13, %s914_s13, %s915_s14  }
   0x8   :  { %s60_s16 = sshll.u32 %s916_s15, 4  ;;  %s917_s17 = smov 64   ;;  %s61_s16 = int_to_ptr.vmem [resolvable:$true] %s60_s16 }
   0x9   :  { %s918_s18 = smov 4   ;;  %s24_s20 = sshll.u32 %s1018_s0, 4  ;;  %s25_s20 = int_to_ptr.hbm [resolvable:$true] %s24_s20 }
   0xa   :  { %66 = dma.hbm_to_vmem [thread:$0]  %s59_s12, 2048, %s61_s16, [#allocation9], %s917_s17, %s917_s17, %s918_s18  }
   0xb   :  { %s919_s21 = smov [#allocation2]   ;;  %s48_s24 = sshll.u32 %s1020_s2, 4  ;;  %s49_s24 = int_to_ptr.hbm [resolvable:$true] %s48_s24 }
   0xc   :  { %s26_s22 = sshll.u32 %s919_s21, 4  ;;  %s920_s25 = smov [#allocation7]   ;;  %s27_s22 = int_to_ptr.vmem [resolvable:$true] %s26_s22 }
   0xd   :  { %29 = dma.hbm_to_vmem [thread:$0]  %s25_s20, 128, %s27_s22, [#allocation3]  }
   0xe   :  { %s50_s26 = sshll.u32 %s920_s25, 4  ;;  %s72_s29 = sshll.u32 %s1022_s4, 4  ;;  %s51_s26 = int_to_ptr.vmem [resolvable:$true] %s50_s26  ;;  %s73_s29 = int_to_ptr.hbm [resolvable:$true] %s72_s29 }
   0xf   :  { %53 = dma.hbm_to_vmem [thread:$0]  %s49_s24, 128, %s51_s26, [#allocation6]  }
  0x10   :  { %s82_s9 = sshll.u32 %s1023_s5, 4  ;;  %s921_s10 = smov [#allocation10]   ;;  %s83_s9 = int_to_ptr.hbm [resolvable:$true] %s82_s9 }
  0x11   :  { %s74_s11 = sshll.u32 %s921_s10, 4  ;;  %s922_s2 = smov [#allocation11]   ;;  %s75_s11 = int_to_ptr.vmem [resolvable:$true] %s74_s11 }
  0x12   :  { %77 = dma.hbm_to_vmem [thread:$0]  %s73_s29, 64, %s75_s11, [#allocation9]  }
  0x13   :  { %s84_s12 = sshll.u32 %s922_s2, 4  ;;  %s85_s12 = int_to_ptr.vmem [resolvable:$true] %s84_s12 }
  0x14   :  { %90 = dma.hbm_to_vmem [thread:$0]  %s83_s9, 1024, %s85_s12, [#allocation12], %s917_s17, %s917_s17, %s918_s18  }
  0x15   :  { %903 = dma.done.wait [#allocation3], 128  }
  0x16   :  { %904 = vsyncadd [#allocation3], 4294967168 }
  0x17   :  { %905 = dma.done.wait [#allocation6], 640  }
  0x18   :  { %906 = vsyncadd [#allocation6], 4294966656 }
  0x19   :  { %907 = dma.done.wait [#allocation9], 2112  }
  0x1a   :  { %908 = vsyncadd [#allocation9], 4294965184 }
  0x1b   :  { %909 = dma.done.wait [#allocation12], 1024  }
  0x1c   :  { %910 = vsyncadd [#allocation12], 4294966272  ;;  %v577_v0 = vld [vmem:[#allocation5 + $0x10] sm:$0xf]  ;;  %v684_v1 = vld [vmem:[#allocation5 + $0x14] sm:$0xf0] }
  0x1d   :  { %v569_v2 = vld [vmem:[#allocation5] sm:$0xf]  ;;  %v578_v3 = vor.u32 %v684_v1, %v577_v0  ;;  %v682_v4 = vld [vmem:[#allocation5 + $0x4] sm:$0xf0]  ;;  %v683_v5 = vld [vmem:[#allocation5 + $0x14] sm:$0xf] }
  0x1e   :  { %v579_v6 = vld [vmem:[#allocation5 + $0x18] sm:$0xf0]  ;;  %v570_v7 = vor.u32 %v682_v4, %v569_v2  ;;  %v681_v10 = vld [vmem:[#allocation5 + $0x4] sm:$0xf]  ;;  %v571_v11 = vld [vmem:[#allocation5 + $0x8] sm:$0xf0] }
  0x1f   :  { %162 = vmatpush.bf16.msra.mxu1 %v578_v3  ;;  %v118_v8 = vld [vmem:[#allocation2] sm:$0xff]  ;;  %v582_v9 = vor.u32 %v683_v5, %v579_v6  ;;  %vm152_vm0 = vcmask 261120   ;;  %v574_v13 = vor.u32 %v681_v10, %v571_v11  ;;  %v989_v15 = vld [vmem:[#allocation7] sm:$0x77]  ;;  %v923_v29 = vmov 256.0   ;;  %v690_v36 = vld [vmem:[#allocation8 + $0x28] sm:$0xff] }
  0x20   :  { %v119_v12 = vpack.c.bf16 %v118_v8, %v118_v8  ;;  %v126_v17 = vperm.slane %v989_v15, 0  ;;  %v127_v18 = vperm.slane %v989_v15, 4  ;;  %723 = vrcp.f32 %v923_v29  ;;  %v692_v30 = vld [vmem:[#allocation8 + $0x38] sm:$0xff]  ;;  %v691_v33 = vld [vmem:[#allocation8 + $0x30] sm:$0xff]  ;;  %v698_v37 = vld [vmem:[#allocation8 + $0x68] sm:$0xff]  ;;  %s550_s17 = sshll.u32 %s1025_s7, 4  ;;  %s551_s17 = int_to_ptr.hbm [resolvable:$true] %s550_s17 }
  0x21   :  { %v700_v31 = vld [vmem:[#allocation8 + $0x78] sm:$0xff]  ;;  %367 = vmatpush.bf16.msra.mxu2 %v692_v30  ;;  %v699_v34 = vld [vmem:[#allocation8 + $0x70] sm:$0xff]  ;;  %v689_v39 = vld [vmem:[#allocation8 + $0x20] sm:$0xff]  ;;  %v217_v0 = vperm.slane %v989_v15, 1  ;;  %v218_v1 = vperm.slane %v989_v15, 5  ;;  %v225_v3 = vperm.slane %v989_v15, 2 }
  0x22   :  { %v130_v19 = vperm.slane %v126_v17, 0  ;;  %v131_v20 = vperm.slane %v127_v18, 0  ;;  %380 = vmatpush.bf16.msra.mxu3 %v700_v31  ;;  %v697_v40 = vld [vmem:[#allocation8 + $0x60] sm:$0xff]  ;;  %v688_v42 = vld [vmem:[#allocation8 + $0x18] sm:$0xff]  ;;  %v687_v45 = vld [vmem:[#allocation8 + $0x10] sm:$0xff]  ;;  %v226_v4 = vperm.slane %v989_v15, 6 }
  0x23   :  { %163 = vmatpush.bf16.msra.mxu1 %v570_v7  ;;  %v696_v43 = vld [vmem:[#allocation8 + $0x58] sm:$0xff]  ;;  %v695_v46 = vld [vmem:[#allocation8 + $0x50] sm:$0xff]  ;;  %v686_v49 = vld [vmem:[#allocation8 + $0x8] sm:$0xff]  ;;  %v221_v8 = vperm.slane %v217_v0, 1  ;;  %vm541_vm10 = vcmask 7168  }
  0x24   :  { %v694_v50 = vld [vmem:[#allocation8 + $0x48] sm:$0xff]  ;;  %v685_v52 = vld [vmem:[#allocation8] sm:$0xff] }
  0x25   :  { %368 = vmatpush.bf16.msra.mxu2 %v691_v33  ;;  %v693_v53 = vld [vmem:[#allocation8 + $0x40] sm:$0xff] }
  0x26   :  { %583 = vmatmul.msk.bf16.vlgmr.msra.gmra.mxu1 %vm152_vm0, %v119_v12  ;;  %v724_v32 = vpop.eup %723  ;;  %381 = vmatpush.bf16.msra.mxu3 %v699_v34  ;;  %v708_v33 = vld [vmem:[#allocation11 + $0x38] sm:$0xff] }
  0x27   :  { %175 = vmatpush.bf16.msrb.mxu1 %v582_v9  ;;  %v186_v35 = vmul.f32 256.0, %v724_v32  ;;  %vm190_vm1 = vweird.f32 %v724_v32  ;;  %v222_v9 = vperm.slane %v218_v1, 1  ;;  %497 = vmatpush.bf16.msra.mxu0 %v708_v33 }
  0x29   :  { %v187_v38 = vsub.f32 1.0, %v186_v35  ;;  %369 = vmatpush.bf16.msra.mxu2 %v690_v36  ;;  %v707_v35 = vld [vmem:[#allocation11 + $0x30] sm:$0xff] }
  0x2a   :  { %382 = vmatpush.bf16.msra.mxu3 %v698_v37  ;;  %v706_v37 = vld [vmem:[#allocation11 + $0x28] sm:$0xff] }
  0x2b   :  { %176 = vmatpush.bf16.msrb.mxu1 %v574_v13  ;;  %v188_v41 = vmul.f32 %v724_v32, %v187_v38  ;;  %498 = vmatpush.bf16.msra.mxu0 %v707_v35 }
  0x2d   :  { %370 = vmatpush.bf16.msra.mxu2 %v689_v39  ;;  %v189_v44 = vadd.f32 %v724_v32, %v188_v41  ;;  %v705_v39 = vld [vmem:[#allocation11 + $0x20] sm:$0xff]  ;;  %v704_v41 = vld [vmem:[#allocation11 + $0x18] sm:$0xff] }
  0x2e   :  { %383 = vmatpush.bf16.msra.mxu3 %v697_v40 }
  0x2f   :  { %v191_v48 = vsel %vm190_vm1, %v724_v32, %v189_v44  ;;  %v924_v32 = vmov 128.0   ;;  %499 = vmatpush.bf16.msra.mxu0 %v706_v37 }
  0x31   :  { %371 = vmatpush.bf16.msra.mxu2 %v688_v42 }
  0x32   :  { %384 = vmatpush.bf16.msra.mxu3 %v696_v43  ;;  %v703_v43 = vld [vmem:[#allocation11 + $0x10] sm:$0xff] }
  0x33   :  { %500 = vmatpush.bf16.msra.mxu0 %v705_v39 }
  0x35   :  { %372 = vmatpush.bf16.msra.mxu2 %v687_v45 }
  0x36   :  { %584 = vmatmul.msk.bf16.vlgmr.msrb.gmra.mxu1 %vm152_vm0, %v119_v12  ;;  %385 = vmatpush.bf16.msra.mxu3 %v695_v46  ;;  %v229_v12 = vperm.slane %v225_v3, 2  ;;  %v702_v46 = vld [vmem:[#allocation11 + $0x8] sm:$0xff] }
  0x37   :  { %501 = vmatpush.bf16.msra.mxu0 %v704_v41 }
  0x39   :  { %373 = vmatpush.bf16.msra.mxu2 %v686_v49 }
  0x3a   :  { %386 = vmatpush.bf16.msra.mxu3 %v694_v50 }
  0x3b   :  { %502 = vmatpush.bf16.msra.mxu0 %v703_v43 }
  0x3d   :  { %374 = vmatpush.bf16.msra.mxu2 %v685_v52 }
  0x3e   :  { %387 = vmatpush.bf16.msra.mxu3 %v693_v53 }
  0x3f   :  { %503 = vmatpush.bf16.msra.mxu0 %v702_v46 }
  0xa3   :  { %v165_v14 = vpop.f32.mrf.mxu1 }
  0xa4   :  { %v993_v22 = vadd.f32 %v165_v14, %v130_v19  ;;  %v230_v14 = vperm.slane %v226_v4, 2 }
  0xa6   :  { %v193_v27 = vmul.f32 %v993_v22, %v993_v22 }
  0xab   :  { %v167_v16 = vpop.f32.mrf.mxu1 }
  0xb3   :  { %v178_v21 = vpop.f32.mrf.mxu1 }
  0xb4   :  { %v995_v23 = vadd.f32 %v178_v21, %v131_v20 }
  0xb6   :  { %v182_v24 = vadd.f32 %v995_v23, %v993_v22  ;;  %v194_v25 = vmul.f32 %v995_v23, %v995_v23 }
  0xb8   :  { %183 = vadd.xlane.f32.xlu0 %v182_v24  ;;  %v195_v28 = vadd.f32 %v194_v25, %v193_v27 }
  0xbb   :  { %v180_v26 = vpop.f32.mrf.mxu1 }
  0xc0   :  { %196 = vadd.xlane.f32.xlu0 %v195_v28 }
 0x12b   :  { %v184_v47 = vpop.xlane.xlu0 %183 }
 0x12c   :  { %v192_v51 = vmul.f32 %v191_v48, %v184_v47 }
 0x12e   :  { %v199_v55 = vmul.f32 %v192_v51, %v192_v51  ;;  %v202_v6 = vsub.f32 %v993_v22, %v192_v51  ;;  %v203_v7 = vsub.f32 %v995_v23, %v192_v51  ;;  %v237_v22 = vld [vmem:[#allocation10] sm:$0x7] }
 0x12f   :  { %v270_v23 = vperm.slane %v237_v22, 0  ;;  %v425_v1 = vperm.slane %v237_v22, 2 }
 0x133   :  { %v197_v54 = vpop.xlane.xlu0 %196 }
 0x134   :  { %v198_v56 = vmul.f32 %v197_v54, %v191_v48  ;;  %v701_v48 = vld [vmem:[#allocation11] sm:$0xff] }
 0x135   :  { %504 = vmatpush.bf16.msra.mxu0 %v701_v48 }
 0x136   :  { %v200_v57 = vsub.f32 %v198_v56, %v199_v55 }
 0x138   :  { %v201_v58 = vmax.f32 %v200_v57, 0.0 }
 0x13a   :  { %v204_v59 = vadd.f32 1e-05, %v201_v58 }
 0x13c   :  { %725 = vrsqrt.f32 %v204_v59  ;;  %vm211_vm3 = vweird.f32 %v204_v59 }
 0x13d   :  { %727 = vrcp.f32 %v924_v32 }
 0x142   :  { %v726_v60 = vpop.eup %725 }
 0x143   :  { %v206_v61 = vmul.f32 %v726_v60, %v204_v59  ;;  %vm212_vm2 = vweird.f32 %v726_v60  ;;  %v728_v34 = vpop.eup %727 }
 0x144   :  { %vm213_vm4 = vmor %vm211_vm3, %vm212_vm2  ;;  %v396_v36 = vmul.f32 128.0, %v728_v34  ;;  %vm400_vm5 = vweird.f32 %v728_v34 }
 0x145   :  { %v207_v62 = vmul.f32 %v726_v60, %v206_v61 }
 0x146   :  { %v397_v38 = vsub.f32 1.0, %v396_v36 }
 0x147   :  { %v208_v63 = vmul.f32 0.5, %v207_v62  ;;  %v423_v62 = vperm.slane %v237_v22, 1 }
 0x148   :  { %v398_v40 = vmul.f32 %v728_v34, %v397_v38 }
 0x149   :  { %v209_v2 = vsub.f32 1.5, %v208_v63 }
 0x14a   :  { %v399_v42 = vadd.f32 %v728_v34, %v398_v40 }
 0x14b   :  { %v210_v5 = vmul.f32 %v726_v60, %v209_v2 }
 0x14c   :  { %v401_v45 = vsel %vm400_vm5, %v728_v34, %v399_v42 }
 0x14d   :  { %v214_v10 = vsel %vm213_vm4, %v726_v60, %v210_v5 }
 0x14e   :  { %v215_v11 = vmul.f32 %v214_v10, %v202_v6  ;;  %v216_v13 = vmul.f32 %v214_v10, %v203_v7  ;;  %v510_v6 = vlaneseq }
 0x150   :  { %v223_v16 = vmul.f32 %v221_v8, %v215_v11  ;;  %v224_v17 = vmul.f32 %v222_v9, %v216_v13  ;;  %v511_v7 = vand.u32 127, %v510_v6  ;;  %v722_v8 = vld [vmem:[%s1024_s6] ss:$0 sm:$0xff]  ;;  %s925_s6 = smov [#allocation13]  }
 0x152   :  { %v231_v18 = vadd.f32 %v229_v12, %v223_v16  ;;  %v232_v19 = vadd.f32 %v230_v14, %v224_v17  ;;  %vm512_vm9 = vcmp.eq.s32.totalorder %v511_v7, 127 }
 0x154   :  { %v233_v20 = vmax.f32 %v231_v18, 0.0  ;;  %v234_v15 = vmax.f32 %v232_v19, 0.0 }
 0x156   :  { %v235_v21 = vpack.c.bf16 %v233_v20, %v233_v20  ;;  %v236_v24 = vpack.c.bf16 %v234_v15, %v234_v15 }
 0x158   :  { %375 = vmatmul.bf16.vlgmr.msra.gmra.mxu2 %v235_v21  ;;  %388 = vmatmul.bf16.vlgmr.msra.gmra.mxu3 %v236_v24 }
 0x1db   :  { %v376_v25 = vpop.f32.mrf.mxu2  ;;  %v389_v26 = vpop.f32.mrf.mxu3 }
 0x1dc   :  { %v377_v27 = vadd.f32 %v376_v25, %v270_v23 }
 0x1de   :  { %v390_v28 = vadd.f32 %v389_v26, %v377_v27 }
 0x1e0   :  { %393 = vadd.xlane.f32.xlu1 %v390_v28  ;;  %v403_v31 = vmul.f32 %v390_v28, %v390_v28 }
 0x1e3   :  { %v378_v29 = vpop.f32.mrf.mxu2  ;;  %v391_v30 = vpop.f32.mrf.mxu3 }
 0x1e8   :  { %404 = vadd.xlane.f32.xlu1 %v403_v31 }
 0x253   :  { %v394_v44 = vpop.xlane.xlu1 %393 }
 0x254   :  { %v402_v47 = vmul.f32 %v401_v45, %v394_v44 }
 0x256   :  { %v407_v50 = vmul.f32 %v402_v47, %v402_v47  ;;  %v410_v61 = vsub.f32 %v390_v28, %v402_v47 }
 0x25b   :  { %v405_v49 = vpop.xlane.xlu1 %404 }
 0x25c   :  { %v406_v51 = vmul.f32 %v405_v49, %v401_v45 }
 0x25e   :  { %v408_v52 = vsub.f32 %v406_v51, %v407_v50 }
 0x260   :  { %v409_v53 = vmax.f32 %v408_v52, 0.0 }
 0x262   :  { %v411_v54 = vadd.f32 1e-05, %v409_v53 }
 0x264   :  { %729 = vrsqrt.f32 %v411_v54  ;;  %vm418_vm7 = vweird.f32 %v411_v54 }
 0x26a   :  { %v730_v55 = vpop.eup %729 }
 0x26b   :  { %v413_v56 = vmul.f32 %v730_v55, %v411_v54  ;;  %vm419_vm6 = vweird.f32 %v730_v55 }
 0x26c   :  { %vm420_vm8 = vmor %vm418_vm7, %vm419_vm6 }
 0x26d   :  { %v414_v57 = vmul.f32 %v730_v55, %v413_v56 }
 0x26f   :  { %v415_v58 = vmul.f32 0.5, %v414_v57 }
 0x271   :  { %v416_v59 = vsub.f32 1.5, %v415_v58 }
 0x273   :  { %v417_v60 = vmul.f32 %v730_v55, %v416_v59 }
 0x275   :  { %v421_v63 = vsel %vm420_vm8, %v730_v55, %v417_v60 }
 0x276   :  { %v422_v0 = vmul.f32 %v421_v63, %v410_v61 }
 0x278   :  { %v424_v2 = vmul.f32 %v423_v62, %v422_v0 }
 0x27a   :  { %v426_v3 = vadd.f32 %v425_v1, %v424_v2 }
 0x27c   :  { %v427_v4 = vmax.f32 %v426_v3, 0.0 }
 0x27e   :  { %v428_v5 = vpack.c.bf16 %v427_v4, %v427_v4 }
 0x280   :  { %505 = vmatmul.bf16.vlgmr.msra.gmra.mxu0 %v428_v5 }
 0x2fd   :  { %v506_v9 = vpop.f32.mrf.mxu0 }
 0x2fe   :  { %v507_v10 = vadd.f32 %v722_v8, %v506_v9 }
 0x300   :  { %v538_v11 = vsel %vm512_vm9, %v507_v10, 0.0  ;;  %v513_v12 = vsel %vm512_vm9, -1e+30, %v507_v10 }
 0x301   :  { %539 = vadd.xlane.f32.xlu0 %v538_v11  ;;  %514 = vmax.xlane.f32.xlu2 %v513_v12 }
 0x305   :  { %v508_v13 = vpop.f32.mrf.mxu0 }
 0x374   :  { %v540_v14 = vpop.xlane.xlu0 %539  ;;  %v515_v16 = vpop.xlane.xlu2 %514 }
 0x375   :  { %542 = vst.msk [vmem:[%s1026_s8] sm:$0xff] %vm541_vm10, %v540_v14  ;;  %v516_v17 = vsub.f32 %v513_v12, %v515_v16  ;;  %s548_s8 = sshll.u32 %s925_s6, 4  ;;  %s549_s8 = int_to_ptr.vmem [resolvable:$true] %s548_s8 }
 0x377   :  { %v517_v18 = vmul.f32 1.442695, %v516_v17 }
 0x379   :  { %731 = vpow2.f32 %v517_v18 }
 0x37f   :  { %v732_v19 = vpop.eup %731 }
 0x380   :  { %519 = vadd.xlane.f32.xlu2 %v732_v19 }
 0x3f3   :  { %v520_v20 = vpop.xlane.xlu2 %519 }
 0x3f4   :  { %733 = vrcp.f32 %v520_v20  ;;  %v532_v22 = vand.u32 2147483648, %v520_v20  ;;  %v530_v25 = vand.u32 2147483647, %v520_v20  ;;  %vm526_vm12 = vweird.f32 %v520_v20 }
 0x3f6   :  { %v533_v27 = vor.u32 1.1754944e-38, %v532_v22  ;;  %vm531_vm14 = vcmp.eq.f32.partialorder %v530_v25, 8.507059e+37 }
 0x3fa   :  { %v734_v15 = vpop.eup %733 }
 0x3fb   :  { %v522_v21 = vmul.f32 %v734_v15, %v520_v20  ;;  %vm527_vm11 = vweird.f32 %v734_v15 }
 0x3fc   :  { %vm528_vm13 = vmor %vm526_vm12, %vm527_vm11 }
 0x3fd   :  { %v523_v24 = vsub.f32 1.0, %v522_v21 }
 0x3ff   :  { %v524_v23 = vmul.f32 %v734_v15, %v523_v24 }
 0x401   :  { %v525_v26 = vadd.f32 %v734_v15, %v524_v23 }
 0x403   :  { %v529_v28 = vsel %vm528_vm13, %v734_v15, %v525_v26 }
 0x404   :  { %v534_v29 = vsel %vm531_vm14, %v533_v27, %v529_v28 }
 0x405   :  { %v535_v30 = vmul.f32 %v732_v19, %v534_v29 }
 0x407   :  { %v536_v31 = vpack.c.bf16 %v535_v30, %v535_v30 }
 0x409   :  { %537 = vst [vmem:[#allocation13] sm:$0xf] %v536_v31 }
 0x40a   :  { %553 = dma.vmem_to_hbm [thread:$0]  %s549_s8, 64, %s551_s17, [#allocation4]  }
 0x40b   :  { %911 = dma.done.wait [#allocation4], 64  }
 0x40c   :  { %912 = vsyncadd [#allocation4], 4294967232 }
 0x40d   :  { %562 = vsyncpa [#allocation3], 1 }
 0x40e   :  { %563 = vsyncpa [#allocation6], 1 }
 0x40f   :  { %564 = vsyncpa [#allocation9], 1 }
 0x410   :  { %565 = vsyncpa [#allocation12], 1 }
 0x411   :  { %566 = vsyncpa [#allocation4], 1 }

</bundles_post_ra>
